<compile_context>
chip_gen: v6e
topology: v6e:2x2x1
jax: 0.10.0
libtpu: 0.0.40
codegen_flags: <defaults>
</compile_context>

<pallas_src>
import jax
import jax.numpy as jnp
import numpy as np
from jax.experimental import pallas as pl
from jax.experimental.pallas import tpu as pltpu


# ----------------------------- kernels ------------------------------------


def _normalize_rows_into(s, o_ref):
    # F.normalize(p=2, dim=1): row / max(||row||_2, 1e-12) via EUP rsqrt.
    ssq = jnp.sum(s * s, axis=1, keepdims=True)
    inv = jax.lax.rsqrt(jnp.maximum(ssq, 1e-24))
    o_ref[...] = (s * inv).astype(o_ref.dtype)


def _kernel_qw_then_da(q_ref, w_ref, dat_ref, b_ref, o_ref):
    # A >= Q path:  s = (q @ W) @ da.T + bias   (da^T already (D, A))
    qw = jnp.dot(q_ref[...], w_ref[...], preferred_element_type=jnp.float32)
    s = jnp.dot(qw.astype(jnp.bfloat16), dat_ref[...],
                preferred_element_type=jnp.float32)
    _normalize_rows_into(s + b_ref[...], o_ref)


def _kernel_wda_cached(q_ref, w_ref, dat_ref, b_ref, o_ref, wda_ref):
    # Q > A path: Wda = W @ da.T computed once (first grid step) into VMEM
    # scratch; every step then does a single q_tile @ Wda.
    @pl.when(pl.program_id(0) == 0)
    def _():
        wda = jnp.dot(w_ref[...], dat_ref[...],
                      preferred_element_type=jnp.float32)
        wda_ref[...] = wda.astype(wda_ref.dtype)

    s = jnp.dot(q_ref[...], wda_ref[...], preferred_element_type=jnp.float32)
    _normalize_rows_into(s + b_ref[...], o_ref)


# ----------------------------- wrapper -------------------------------------


def _round_up(x, m):
    return (x + m - 1) // m * m


def _resident_spec(shape):
    # Grid-invariant operand: constant index_map, so double buffering only
    # wastes VMEM.  Single-buffer when the installed JAX supports it.
    idx = lambda i: (0, 0)
    if hasattr(pl, "Buffered"):
        try:
            return pl.BlockSpec(shape, idx, pipeline_mode=pl.Buffered(1))
        except Exception:
            pass
    return pl.BlockSpec(shape, idx)


def _vmem_limit_bytes():
    cap = None
    try:
        info = pltpu.get_tpu_info()
        cap = getattr(info, "vmem_capacity_bytes", None)
    except Exception:
        cap = None
    if not cap:
        cap = 64 * 1024 * 1024  # conservative (v7x-sized) fallback
    # 75% of physical VMEM, clamped to a sane range on all generations.
    return max(32 * 1024 * 1024, min(int(cap) * 3 // 4, 112 * 1024 * 1024))


def predict_layer_forward(q_embedding, da_embedding, weight, bias, *, tq=None):
    Q, D = q_embedding.shape
    A, Dd = da_embedding.shape
    assert D == Dd
    assert weight.shape == (D, D)
    assert bias.shape == (Q, A)

    f32, bf16 = jnp.float32, jnp.bfloat16
    reassoc = Q > A  # q @ (W @ da.T) is cheaper than (q @ W) @ da.T iff Q > A

    # Exact zero padding to lane/sublane friendly sizes.
    D_pad = _round_up(D, 128)
    A_pad = _round_up(A, 128)
    Q8 = _round_up(Q, 8)

    vmem_limit = _vmem_limit_bytes()

    # Resident (grid-invariant) VMEM: W + da^T in bf16 (+ Wda scratch if reassoc).
    resident = 2 * (D_pad * D_pad + D_pad * A_pad)
    if reassoc:
        resident += 2 * D_pad * A_pad
    # Streamed bytes per Q row: q bf16 + bias f32 + out f32 (double-buffered)
    # plus ~f32 compute intermediates.
    per_row = 2 * (2 * D_pad + 4 * A_pad + 4 * A_pad) + 4 * (D_pad + 2 * A_pad)

    if tq is None:
        avail = vmem_limit - resident - (4 << 20)  # headroom
        cand = max(avail // per_row, 8)
        cand = cand // 256 * 256 if cand >= 256 else max(8, cand // 8 * 8)
        tq = int(min(Q8, max(8, cand)))
        # Give v7x's second TensorCore work when the problem has enough rows.
        if (not reassoc) and Q8 >= 16 and tq >= Q8:
            tq = _round_up(pl.cdiv(Q8, 2), 8)
    tq = int(min(_round_up(int(tq), 8), Q8))

    Q_pad = _round_up(Q8, tq)
    grid = (Q_pad // tq,)

    def pad2(x, rows, cols, dtype):
        x = x.astype(dtype)
        pr, pc = rows - x.shape[0], cols - x.shape[1]
        if pr or pc:
            x = jnp.pad(x, ((0, pr), (0, pc)))
        return x

    q_p = pad2(q_embedding, Q_pad, D_pad, bf16)          # (Q_pad, D_pad)
    w_p = pad2(weight, D_pad, D_pad, bf16)               # (D_pad, D_pad)
    dat_p = pad2(da_embedding, A_pad, D_pad, bf16).T     # (D_pad, A_pad), once in XLA
    b_p = pad2(bias, Q_pad, A_pad, f32)                  # (Q_pad, A_pad)

    if reassoc:
        flops = 2 * D_pad * A_pad * (D_pad + Q_pad)
    else:
        flops = 2 * Q_pad * D_pad * (D_pad + A_pad)
    bytes_accessed = (q_p.size + w_p.size + dat_p.size) * 2 \
        + (b_p.size + Q_pad * A_pad) * 4
    cost = pl.CostEstimate(flops=int(flops), transcendentals=int(Q_pad),
                           bytes_accessed=int(bytes_accessed))

    kernel = _kernel_wda_cached if reassoc else _kernel_qw_then_da
    scratch_shapes = [pltpu.VMEM((D_pad, A_pad), bf16)] if reassoc else []
    # The Wda scratch is filled on grid step 0 and reused -> Q axis must run
    # serially on one core in that mode; otherwise megacore-parallel.
    semantics = ("arbitrary",) if reassoc else ("parallel",)

    out = pl.pallas_call(
        kernel,
        out_shape=jax.ShapeDtypeStruct((Q_pad, A_pad), f32),
        grid_spec=pltpu.PrefetchScalarGridSpec(
            num_scalar_prefetch=0,
            grid=grid,
            in_specs=[
                pl.BlockSpec((tq, D_pad), lambda i: (i, 0)),   # q tile
                _resident_spec((D_pad, D_pad)),                # W (resident, 1-buf)
                _resident_spec((D_pad, A_pad)),                # da^T (resident, 1-buf)
                pl.BlockSpec((tq, A_pad), lambda i: (i, 0)),   # bias tile
            ],
            out_specs=pl.BlockSpec((tq, A_pad), lambda i: (i, 0)),
            scratch_shapes=scratch_shapes,
        ),
        compiler_params=pltpu.CompilerParams(
            dimension_semantics=semantics,
            vmem_limit_bytes=vmem_limit,
        ),
        cost_estimate=cost,
    )(q_p, w_p, dat_p, b_p)

    return out[:Q, :A]


# ----------------------------- reference / test -----------------------------


def _reference_f64(q_embedding, da_embedding, weight, bias):
    q = np.asarray(q_embedding, dtype=np.float64)
    da = np.asarray(da_embedding, dtype=np.float64)
    w = np.asarray(weight, dtype=np.float64)
    b = np.asarray(bias, dtype=np.float64)
    s = (q @ w) @ da.T + b
    norm = np.sqrt(np.sum(s * s, axis=1, keepdims=True))
    return s / np.maximum(norm, 1e-12)


if __name__ == "__main__":
    base_key = jax.random.PRNGKey(0)

    def run_case(q_size, da_size, D, key):
        k1, k2, k3, k4 = jax.random.split(key, 4)
        weight = jax.random.normal(k1, (D, D), dtype=jnp.float32)
        bias = jax.random.normal(k2, (q_size, da_size), dtype=jnp.float32)
        q_embedding = jax.random.normal(k3, (q_size, D), dtype=jnp.float32)
        da_embedding = jax.random.normal(k4, (da_size, D), dtype=jnp.float32)

        out = predict_layer_forward(q_embedding, da_embedding, weight, bias)
        out = jax.block_until_ready(out)
        ref = _reference_f64(q_embedding, da_embedding, weight, bias)

        assert out.shape == (q_size, da_size)
        # bf16 MXU operands with f32 accumulation on normalized ([-1,1]) outputs.
        assert np.allclose(np.asarray(out, dtype=np.float64), ref,
                           atol=2e-2, rtol=2e-2), \
            f"mismatch vs reference (Q={q_size}, A={da_size}, D={D})"

    # Case 1: module-like small shapes, A >= Q -> (q@W)@da.T path.
    run_case(q_size=8, da_size=16, D=32, key=jax.random.fold_in(base_key, 0))
    # Case 2: Q > A -> reassociated path (Wda cached in VMEM scratch).
    run_case(q_size=32, da_size=8, D=16, key=jax.random.fold_in(base_key, 1))

    print("KERNEL_OK")
</pallas_src>

<mosaic_0001>
module attributes {stable_mosaic.version = 11 : i64} {
  func.func @_kernel_qw_then_da(%arg0: i32, %arg1: memref<8x128xbf16, #tpu.memory_space<vmem>>, %arg2: memref<128x128xbf16, #tpu.memory_space<vmem>>, %arg3: memref<128x128xbf16, #tpu.memory_space<vmem>>, %arg4: memref<8x128xf32, #tpu.memory_space<vmem>>, %arg5: memref<8x128xf32, #tpu.memory_space<vmem>>) attributes {dimension_semantics = [#tpu.dimension_semantics<parallel>], iteration_bounds = array<i64: 1>, scalar_prefetch = 0 : i64, scratch_operands = 0 : i64, tpu.core_type = #tpu.core_type<tc>, window_params = [{transform_indices = @transform_0, window_bounds = array<i64: 8, 128>}, {pipeline_mode = #tpu.pipeline_mode<synchronous>, transform_indices = @transform_1, window_bounds = array<i64: 128, 128>}, {pipeline_mode = #tpu.pipeline_mode<synchronous>, transform_indices = @transform_2, window_bounds = array<i64: 128, 128>}, {transform_indices = @transform_3, window_bounds = array<i64: 8, 128>}, {transform_indices = @transform_4, window_bounds = array<i64: 8, 128>}]} {
    %c0 = arith.constant 0 : index
    %c0_0 = arith.constant 0 : index
    %0 = vector.load %arg1[%c0, %c0_0] : memref<8x128xbf16, #tpu.memory_space<vmem>>, vector<8x128xbf16>
    %c0_1 = arith.constant 0 : index
    %c0_2 = arith.constant 0 : index
    %1 = vector.load %arg2[%c0_1, %c0_2] : memref<128x128xbf16, #tpu.memory_space<vmem>>, vector<128x128xbf16>
    %cst = arith.constant dense<0.000000e+00> : vector<8x128xf32>
    %2 = tpu.matmul %0, %1, %cst {dimension_numbers = #tpu.dot_dimension_numbers<[1], [0], [0], [1], [0, 0, 1, 1], [], []>} : vector<8x128xbf16>, vector<128x128xbf16>, vector<8x128xf32> -> vector<8x128xf32>
    %3 = arith.truncf %2 : vector<8x128xf32> to vector<8x128xbf16>
    %c0_3 = arith.constant 0 : index
    %c0_4 = arith.constant 0 : index
    %4 = vector.load %arg3[%c0_3, %c0_4] : memref<128x128xbf16, #tpu.memory_space<vmem>>, vector<128x128xbf16>
    %cst_5 = arith.constant dense<0.000000e+00> : vector<8x128xf32>
    %5 = tpu.matmul %3, %4, %cst_5 {dimension_numbers = #tpu.dot_dimension_numbers<[1], [0], [0], [1], [0, 0, 1, 1], [], []>} : vector<8x128xbf16>, vector<128x128xbf16>, vector<8x128xf32> -> vector<8x128xf32>
    %c0_6 = arith.constant 0 : index
    %c0_7 = arith.constant 0 : index
    %6 = vector.load %arg4[%c0_6, %c0_7] : memref<8x128xf32, #tpu.memory_space<vmem>>, vector<8x128xf32>
    %7 = arith.addf %5, %6 : vector<8x128xf32>
    %8 = arith.mulf %7, %7 : vector<8x128xf32>
    %cst_8 = arith.constant dense<0.000000e+00> : vector<8xf32>
    %9 = vector.multi_reduction <add>, %8, %cst_8 [1] : vector<8x128xf32> to vector<8xf32>
    %10 = vector.shape_cast %9 : vector<8xf32> to vector<8x1xf32>
    %cst_9 = arith.constant 1.000000e-24 : f32
    %11 = vector.broadcast %cst_9 : f32 to vector<8x1xf32>
    %12 = arith.maximumf %10, %11 : vector<8x1xf32>
    %13 = math.rsqrt %12 : vector<8x1xf32>
    %14 = vector.broadcast %13 : vector<8x1xf32> to vector<8x128xf32>
    %15 = arith.mulf %7, %14 : vector<8x128xf32>
    %c0_10 = arith.constant 0 : index
    %c0_11 = arith.constant 0 : index
    %16 = vector.load %arg5[%c0_10, %c0_11] : memref<8x128xf32, #tpu.memory_space<vmem>>, vector<8x128xf32>
    tpu.vector_store %arg5[%c0_10, %c0_11], %15 {strides = array<i32>} : memref<8x128xf32, #tpu.memory_space<vmem>>, vector<8x128xf32>,
    return
  }
  func.func @transform_0(%arg0: i32) -> (i32, i32) {
    %c0_i32 = arith.constant 0 : i32
    %c0_i32_0 = arith.constant 0 : i32
    return %arg0, %c0_i32 : i32, i32
  }
  func.func @transform_1(%arg0: i32) -> (i32, i32) {
    %c0_i32 = arith.constant 0 : i32
    %c0_i32_0 = arith.constant 0 : i32
    %c0_i32_1 = arith.constant 0 : i32
    return %c0_i32, %c0_i32_0 : i32, i32
  }
  func.func @transform_2(%arg0: i32) -> (i32, i32) {
    %c0_i32 = arith.constant 0 : i32
    %c0_i32_0 = arith.constant 0 : i32
    %c0_i32_1 = arith.constant 0 : i32
    return %c0_i32, %c0_i32_0 : i32, i32
  }
  func.func @transform_3(%arg0: i32) -> (i32, i32) {
    %c0_i32 = arith.constant 0 : i32
    %c0_i32_0 = arith.constant 0 : i32
    return %arg0, %c0_i32 : i32, i32
  }
  func.func @transform_4(%arg0: i32) -> (i32, i32) {
    %c0_i32 = arith.constant 0 : i32
    %c0_i32_0 = arith.constant 0 : i32
    return %arg0, %c0_i32 : i32, i32
  }
}

</mosaic_0001>

<bundles_post_ra>
// kernel: tpu_custom_call.1
= control target key start
LH: loop header
LB: loop body
LE: loop exit
PB: predicated region body
PF: predicated region fallthrough
CT: control target
= control target key end

     0   :  { %9 = vsyncpa [#allocation3], 0  ;;  %s563_s0 = inlined_call_operand.hbm [shape: bf16[8,128], index: 0, kind: input, shape index: {}]   ;;  %s564_s1 = inlined_call_operand.hbm [shape: bf16[128,128], index: 1, kind: input, shape index: {}]   ;;  %s565_s2 = inlined_call_operand.hbm [shape: bf16[128,128], index: 2, kind: input, shape index: {}]   ;;  %s566_s3 = inlined_call_operand.hbm [shape: f32[8,128], index: 3, kind: input, shape index: {}]   ;;  %s567_s4 = inlined_call_operand.hbm [shape: f32[8,128], index: 4, kind: output, shape index: {}]  }
   0x1   :  { %10 = vsyncpa [#allocation6], 0 }
   0x2   :  { %11 = vsyncpa [#allocation9], 0 }
   0x3   :  { %12 = vsyncpa [#allocation4], 0  ;;  %s514_s15 = smov [#allocation5]  }
   0x4   :  { %s28_s16 = sshll.u32 %s514_s15, 4  ;;  %s29_s16 = int_to_ptr.vmem [resolvable:$true] %s28_s16 }
   0x5   :  { %s414_s17 = scalar_lea.vmem %s29_s16, 1024  ;;  %p419_p1 = scmp.lt.s32.totalorder %s29_s16, %s29_s16 }
   0x6   :  { %p415_p0 = scmp.ne.s32.totalorder %s29_s16, %s414_s17  ;;  %p420_p2 = scmp.lt.s32.totalorder %s414_s17, %s414_s17 }
   0x8   :  { %p421_p3 = por %p420_p2, %p419_p1 }
   0xa   :  { %p422_p4 = pnand %p421_p3, %p415_p0 }
   0xc   :  { %425 = shalt.err (!%p422_p4)
}
   0xd   :  { %s515_s18 = smov 64   ;;  %s516_s19 = smov 4  }
   0xe   :  { %34 = dma.hbm_to_vmem [thread:$0]  %s564_s1, 1024, %s29_s16, [#allocation6], %s515_s18, %s515_s18, %s516_s19  }
   0xf   :  { %s517_s22 = smov [#allocation2]   ;;  %s518_s24 = smov [#allocation7]  }
  0x10   :  { %s19_s23 = sshll.u32 %s517_s22, 4  ;;  %s40_s25 = sshll.u32 %s518_s24, 4  ;;  %s20_s23 = int_to_ptr.vmem [resolvable:$true] %s19_s23  ;;  %s41_s25 = int_to_ptr.vmem [resolvable:$true] %s40_s25 }
  0x11   :  { %s434_s26 = scalar_lea.vmem %s20_s23, 64  ;;  %p439_p6 = scmp.lt.s32.totalorder %s20_s23, %s20_s23 }
  0x12   :  { %p435_p5 = scmp.ne.s32.totalorder %s20_s23, %s434_s26  ;;  %p440_p7 = scmp.lt.s32.totalorder %s434_s26, %s434_s26 }
  0x14   :  { %p441_p8 = por %p440_p7, %p439_p6 }
  0x16   :  { %p442_p9 = pnand %p441_p8, %p435_p5 }
  0x18   :  { %445 = shalt.err (!%p442_p9)
}
  0x19   :  { %22 = dma.hbm_to_vmem [thread:$0]  %s563_s0, 64, %s20_s23, [#allocation3]  }
  0x1a   :  { %s454_s29 = scalar_lea.vmem %s41_s25, 1024  ;;  %p459_p11 = scmp.lt.s32.totalorder %s41_s25, %s41_s25 }
  0x1b   :  { %p455_p10 = scmp.ne.s32.totalorder %s41_s25, %s454_s29  ;;  %p460_p12 = scmp.lt.s32.totalorder %s454_s29, %s454_s29 }
  0x1d   :  { %p461_p13 = por %p460_p12, %p459_p11 }
  0x1f   :  { %p462_p0 = pnand %p461_p13, %p455_p10 }
  0x21   :  { %465 = shalt.err (!%p462_p0)
}
  0x22   :  { %46 = dma.hbm_to_vmem [thread:$0]  %s565_s2, 1024, %s41_s25, [#allocation6], %s515_s18, %s515_s18, %s516_s19  }
  0x23   :  { %s519_s5 = smov [#allocation8]  }
  0x24   :  { %s53_s6 = sshll.u32 %s519_s5, 4  ;;  %s54_s6 = int_to_ptr.vmem [resolvable:$true] %s53_s6 }
  0x25   :  { %s474_s7 = scalar_lea.vmem %s54_s6, 128  ;;  %p479_p2 = scmp.lt.s32.totalorder %s54_s6, %s54_s6 }
  0x26   :  { %p475_p1 = scmp.ne.s32.totalorder %s54_s6, %s474_s7  ;;  %p480_p3 = scmp.lt.s32.totalorder %s474_s7, %s474_s7 }
  0x28   :  { %p481_p4 = por %p480_p3, %p479_p2 }
  0x2a   :  { %p482_p5 = pnand %p481_p4, %p475_p1 }
  0x2c   :  { %485 = shalt.err (!%p482_p5)
}
  0x2d   :  { %56 = dma.hbm_to_vmem [thread:$0]  %s566_s3, 128, %s54_s6, [#allocation9]  }
  0x2e   :  { %506 = dma.done.wait [#allocation3], 64  }
  0x2f   :  { %507 = vsyncadd [#allocation3], 4294967232 }
  0x30   :  { %508 = dma.done.wait [#allocation6], 2048  }
  0x31   :  { %509 = vsyncadd [#allocation6], 4294965248 }
  0x32   :  { %510 = dma.done.wait [#allocation9], 128  }
  0x33   :  { %511 = vsyncadd [#allocation9], 4294967168  ;;  %v520_v0 = vmov 0.0   ;;  %vm521_vm0 = vmmov 0   ;;  %v388_v1 = vld [vmem:[#allocation5 + $0x38] sm:$0xff]   ;;  %v389_v2 = vld [vmem:[#allocation5 + $0x30] sm:$0xff]  }
  0x34   :  { %339 = vmatprep.subr.bf16.mxu0 %v520_v0  ;;  %355 = vmatprep.mubr.msk.bf16.mxu0 %vm521_vm0, %v520_v0  ;;  %v390_v3 = vld [vmem:[#allocation5 + $0x28] sm:$0xff]   ;;  %v396_v4 = vld [vmem:[#allocation7 + $0x38] sm:$0xff]   ;;  %v391_v5 = vld [vmem:[#allocation5 + $0x20] sm:$0xff]   ;;  %s522_s2 = smov [#allocation10]  }
  0x35   :  { %359 = vmatprep.subr.bf16.mxu1 %v520_v0  ;;  %375 = vmatprep.mubr.msk.bf16.mxu1 %vm521_vm0, %v520_v0  ;;  %v397_v6 = vld [vmem:[#allocation7 + $0x30] sm:$0xff]   ;;  %v392_v7 = vld [vmem:[#allocation5 + $0x18] sm:$0xff]   ;;  %v398_v8 = vld [vmem:[#allocation7 + $0x28] sm:$0xff]   ;;  %s294_s3 = sshll.u32 %s522_s2, 4  ;;  %s295_s3 = int_to_ptr.vmem [resolvable:$true] %s294_s3 }
  0x36   :  { %340 = vmatpush3.bf16.msra.mxu0 %v388_v1  ;;  %360 = vmatpush3.bf16.msra.mxu1 %v396_v4  ;;  %v393_v9 = vld [vmem:[#allocation5 + $0x10] sm:$0xff]   ;;  %v399_v10 = vld [vmem:[#allocation7 + $0x20] sm:$0xff]   ;;  %v394_v11 = vld [vmem:[#allocation5 + $0x8] sm:$0xff]   ;;  %s486_s9 = scalar_lea.vmem %s295_s3, 128  ;;  %p491_p7 = scmp.lt.s32.totalorder %s295_s3, %s295_s3 }
  0x37   :  { %341 = vmatprep.subr.bf16.mxu0 %v520_v0  ;;  %361 = vmatprep.subr.bf16.mxu1 %v520_v0  ;;  %v400_v12 = vld [vmem:[#allocation7 + $0x18] sm:$0xff]   ;;  %v395_v13 = vld [vmem:[#allocation5] sm:$0xff]   ;;  %v401_v14 = vld [vmem:[#allocation7 + $0x10] sm:$0xff]   ;;  %p487_p6 = scmp.ne.s32.totalorder %s295_s3, %s486_s9  ;;  %p492_p8 = scmp.lt.s32.totalorder %s486_s9, %s486_s9 }
  0x38   :  { %v70_v15 = vld [vmem:[#allocation2] sm:$0xf]  ;;  %v402_v16 = vld [vmem:[#allocation7 + $0x8] sm:$0xff]   ;;  %v403_v17 = vld [vmem:[#allocation7] sm:$0xff]  }
  0x39   :  { %v192_v23 = vld [vmem:[#allocation8] sm:$0xff]  ;;  %p493_p9 = por %p492_p8, %p491_p7 }
  0x3a   :  { %342 = vmatpush3.bf16.msra.mxu0 %v389_v2  ;;  %362 = vmatpush3.bf16.msra.mxu1 %v397_v6 }
  0x3b   :  { %343 = vmatprep.subr.bf16.mxu0 %v520_v0  ;;  %363 = vmatprep.subr.bf16.mxu1 %v520_v0  ;;  %p494_p10 = pnand %p493_p9, %p487_p6 }
  0x3e   :  { %344 = vmatpush3.bf16.msra.mxu0 %v390_v3  ;;  %364 = vmatpush3.bf16.msra.mxu1 %v398_v8 }
  0x3f   :  { %345 = vmatprep.subr.bf16.mxu0 %v520_v0  ;;  %365 = vmatprep.subr.bf16.mxu1 %v520_v0 }
  0x42   :  { %346 = vmatpush3.bf16.msra.mxu0 %v391_v5  ;;  %366 = vmatpush3.bf16.msra.mxu1 %v399_v10 }
  0x43   :  { %347 = vmatprep.subr.bf16.mxu0 %v520_v0  ;;  %367 = vmatprep.subr.bf16.mxu1 %v520_v0 }
  0x46   :  { %348 = vmatpush3.bf16.msra.mxu0 %v392_v7  ;;  %368 = vmatpush3.bf16.msra.mxu1 %v400_v12 }
  0x47   :  { %349 = vmatprep.subr.bf16.mxu0 %v520_v0  ;;  %369 = vmatprep.subr.bf16.mxu1 %v520_v0 }
  0x4a   :  { %350 = vmatpush3.bf16.msra.mxu0 %v393_v9  ;;  %370 = vmatpush3.bf16.msra.mxu1 %v401_v14 }
  0x4b   :  { %351 = vmatprep.subr.bf16.mxu0 %v520_v0  ;;  %371 = vmatprep.subr.bf16.mxu1 %v520_v0 }
  0x4e   :  { %352 = vmatpush3.bf16.msra.mxu0 %v394_v11  ;;  %372 = vmatpush3.bf16.msra.mxu1 %v402_v16 }
  0x4f   :  { %353 = vmatprep.subr.bf16.mxu0 %v520_v0  ;;  %373 = vmatprep.subr.bf16.mxu1 %v520_v0 }
  0x52   :  { %354 = vmatpush3.bf16.msra.mxu0 %v395_v13  ;;  %374 = vmatpush3.bf16.msra.mxu1 %v403_v17 }
  0x55   :  { %356 = vmatmul.mubr.bf16.vlgmr.msra.gmra.mxu0 %v70_v15 }
 0x115   :  { %v169_v18 = vpop.f32.mrf.mxu0 }
 0x116   :  { %v175_v19 = vpack.c.bf16 %v169_v18, %v169_v18 }
 0x117   :  { %v357_v20 = vpop.f32.mrf.mxu0 }
 0x118   :  { %376 = vmatmul.mubr.bf16.vlgmr.msra.gmra.mxu1 %v175_v19 }
 0x119   :  { %v172_v21 = vpop.f32.mrf.mxu0 }
 0x11b   :  { %v358_v22 = vpop.f32.mrf.mxu0 }
 0x1d8   :  { %v275_v24 = vpop.f32.mrf.mxu1 }
 0x1d9   :  { %v276_v25 = vadd.f32 %v275_v24, %v192_v23 }
 0x1da   :  { %v377_v26 = vpop.f32.mrf.mxu1 }
 0x1db   :  { %v281_v27 = vmul.f32 %v276_v25, %v276_v25 }
 0x1dc   :  { %v278_v28 = vpop.f32.mrf.mxu1 }
 0x1dd   :  { %282 = vadd.xlane.f32.xlu0 %v281_v27 }
 0x1de   :  { %v378_v29 = vpop.f32.mrf.mxu1 }
 0x266   :  { %v283_v30 = vpop.xlane.xlu0 %282 }
 0x267   :  { %v284_v31 = vmax.f32 %v283_v30, 1e-24 }
 0x269   :  { %404 = vrsqrt.f32 %v284_v31 }
 0x276   :  { %v405_v32 = vpop.eup %404 }
 0x277   :  { %v286_v33 = vmul.f32 %v405_v32, %v276_v25 }
 0x279   :  { %287 = vst [vmem:[#allocation10] sm:$0xff] %v286_v33 }
 0x27a   :  { %497 = shalt.err (!%p494_p10)
}
 0x27b   :  { %297 = dma.vmem_to_hbm [thread:$0]  %s295_s3, 128, %s567_s4, [#allocation4]  }
 0x27c   :  { %512 = dma.done.wait [#allocation4], 128  }
 0x27d   :  { %513 = vsyncadd [#allocation4], 4294967168 }
 0x27e   :  { %301 = vsyncpa [#allocation3], 1 }
 0x27f   :  { %302 = vsyncpa [#allocation6], 1 }
 0x280   :  { %303 = vsyncpa [#allocation9], 1 }
 0x281   :  { %304 = vsyncpa [#allocation4], 1 }

</bundles_post_ra>
